<compile_context>
chip_gen: v5e
topology: v5e:2x2
jax: 0.10.0
libtpu: 0.0.40
codegen_flags: <defaults>
</compile_context>

<pallas_src>
import jax
import jax.numpy as jnp
import numpy as np
from jax.experimental import pallas as pl
from jax.experimental.pallas import tpu as pltpu


def strip_pooling_kernel(x_ref, w1t_ref, b1_ref, ph_ref, pw_ref,
                         wa_ref, ba_ref, w20_ref, w22_ref, sr_ref, sl_ref,
                         wb_ref, bb_ref, w4t_ref, b4_ref, bc7_ref, bc8_ref,
                         o_ref):
    f32 = jnp.float32
    x = x_ref[0]                                   # (C, H*W), channels-first
    Cm = w1t_ref.shape[0]

    # ---- conv1 (1x1) + BN + ReLU -----------------------------------------
    x1 = jnp.maximum(
        jnp.dot(w1t_ref[...], x, preferred_element_type=f32) + b1_ref[...],
        0.0)                                       # (Cm, H*W)

    # ---- strip pools as matmuls with precomputed averaging matrices -------
    xp1 = jnp.dot(x1, ph_ref[...], preferred_element_type=f32)   # (Cm, W)  mean over H
    xp2 = jnp.dot(x1, pw_ref[...], preferred_element_type=f32)   # (Cm, H)  mean over W

    # ---- branch A (along W): fused [conv2 center | conv2_1..conv2_4] ------
    preA = jnp.dot(wa_ref[...], xp1, preferred_element_type=f32) + ba_ref[...]  # (5Cm, W)
    # (1,3)-conv edge taps, positioned via 0/1 shift matrices (no lane concats)
    t0 = jnp.dot(w20_ref[...], xp1, preferred_element_type=f32)   # tap from w-1
    t2 = jnp.dot(w22_ref[...], xp1, preferred_element_type=f32)   # tap from w+1
    edge = (jnp.dot(t0, sr_ref[...], preferred_element_type=f32)
            + jnp.dot(t2, sl_ref[...], preferred_element_type=f32))             # (Cm, W)
    out7 = jnp.concatenate(
        [preA[:Cm] + edge,                    # conv2: Conv+BN, no ReLU
         jnp.maximum(preA[Cm:], 0.0)],        # conv2_1..4: ReLU
        axis=0)                               # (5Cm, W)

    # ---- branch B (along H): conv2 on a width-1 strip keeps only its center tap
    preB = jnp.dot(wb_ref[...], xp2, preferred_element_type=f32) + bb_ref[...]  # (5Cm, H)
    out8 = jnp.concatenate([preB[:Cm], jnp.maximum(preB[Cm:], 0.0)], axis=0)

    # ---- conv4 is linear: apply to the 1-D strips, then broadcast-add -----
    o7 = jnp.dot(w4t_ref[...], out7, preferred_element_type=f32)  # (C, W)
    o8 = jnp.dot(w4t_ref[...], out8, preferred_element_type=f32)  # (C, H)
    # align_corners bilinear upsample of a size-1 axis == broadcast; done with
    # 0/1 broadcast matrices so the result is built directly in (C, H*W) form.
    x9 = jnp.maximum(
        jnp.dot(o7, bc7_ref[...], preferred_element_type=f32)
        + jnp.dot(o8, bc8_ref[...], preferred_element_type=f32)
        + b4_ref[...],
        0.0)                                       # (C, H*W); ReLU is part of conv4

    o_ref[0] = x * jax.nn.sigmoid(x9)              # sigmoid gate


def strip_pooling(x_nchw, params):
    """x_nchw: (N, C, H, W) float32.  Returns (N, C, H, W)."""
    N, C, H, W = x_nchw.shape
    x = x_nchw.reshape(N, C, H * W).astype(jnp.float32)   # free reshape, no transpose

    # TODO(synk): for very large H*W (e.g. v7x with 64 MiB VMEM) this single
    # full-image block should be split into a streamed pool-pass + apply-pass
    # with a spatial "parallel" grid axis; at these sizes one block per batch
    # element is well within VMEM and N batches shard across TensorCores.
    param_specs = [pl.BlockSpec(p.shape, lambda n: (0, 0)) for p in params]
    out = pl.pallas_call(
        strip_pooling_kernel,
        out_shape=jax.ShapeDtypeStruct((N, C, H * W), jnp.float32),
        grid=(N,),
        in_specs=[pl.BlockSpec((1, C, H * W), lambda n: (n, 0, 0))] + param_specs,
        out_specs=pl.BlockSpec((1, C, H * W), lambda n: (n, 0, 0)),
        compiler_params=pltpu.CompilerParams(
            dimension_semantics=("parallel",),
            vmem_limit_bytes=32 * 1024 * 1024),
    )(x, *params)
    return out.reshape(N, C, H, W)


def init_raw_weights(key, in_channels):
    """Deterministic synthetic weights; BN (eval mode) folded into the convs."""
    C = in_channels
    Cm = C // 4
    eps = 1e-5
    bn = 1.0 / np.sqrt(1.0 + eps)   # gamma=1, beta=0, mean=0, var=1
    ks = jax.random.split(key, 5)
    rnd = lambda k, s: jax.random.normal(k, s, jnp.float32) * 0.1
    return {
        'w1': rnd(ks[0], (C, Cm)) * bn,       # conv1 (1x1): x_cl @ w1
        'w2': rnd(ks[1], (3, Cm, Cm)) * bn,   # conv2 (1,3): tap-major, (cin, cout)
        'wA': rnd(ks[2], (4, Cm, Cm)) * bn,   # conv2_1..conv2_4 (dilation irrelevant for 1x1)
        'wB': rnd(ks[3], (4, Cm, Cm)) * bn,   # conv3_1..conv3_4
        'w4': rnd(ks[4], (5 * Cm, C)) * bn,   # conv4 (1x1)
        'b1': jnp.zeros((Cm,), jnp.float32),
        'b2': jnp.zeros((Cm,), jnp.float32),
        'bA': jnp.zeros((4, Cm), jnp.float32),
        'bB': jnp.zeros((4, Cm), jnp.float32),
        'b4': jnp.zeros((C,), jnp.float32),
    }


def pack_params(raw, H, W):
    """Transpose/fuse the folded weights for the channels-first kernel and build
    the constant 0/1 matrices expressing pooling, shifts and the broadcast."""
    f32 = np.float32
    w1t = raw['w1'].T                                              # (Cm, C)
    b1 = raw['b1'][:, None]
    ph = jnp.asarray(np.tile(np.eye(W, dtype=f32), (H, 1)) / H)    # (HW, W): mean over H
    pw = jnp.asarray(np.repeat(np.eye(H, dtype=f32), W, axis=0) / W)  # (HW, H): mean over W
    wa = jnp.concatenate([raw['w2'][1].T] + [raw['wA'][i].T for i in range(4)], axis=0)
    ba = jnp.concatenate([raw['b2']] + [raw['bA'][i] for i in range(4)])[:, None]
    w20 = raw['w2'][0].T
    w22 = raw['w2'][2].T
    sr = jnp.asarray(np.eye(W, k=1, dtype=f32))     # col j takes value from j-1
    sl = jnp.asarray(np.eye(W, k=-1, dtype=f32))    # col j takes value from j+1
    wb = jnp.concatenate([raw['w2'][1].T] + [raw['wB'][i].T for i in range(4)], axis=0)
    bb = jnp.concatenate([raw['b2']] + [raw['bB'][i] for i in range(4)])[:, None]
    w4t = raw['w4'].T                                              # (C, 5Cm)
    b4 = raw['b4'][:, None]
    bc7 = jnp.asarray(np.tile(np.eye(W, dtype=f32), (1, H)))       # (W, HW): broadcast over H
    bc8 = jnp.asarray(np.repeat(np.eye(H, dtype=f32), W, axis=1))  # (H, HW): broadcast over W
    return [w1t, b1, ph, pw, wa, ba, w20, w22, sr, sl, wb, bb, w4t, b4, bc7, bc8]


def ref_forward(x_nchw, raw):
    """Independent pure-JAX reference (NHWC math, no fusion/factorization)."""
    x = jnp.transpose(x_nchw, (0, 2, 3, 1)).astype(jnp.float32)
    w1, w2, wA, wB, w4 = raw['w1'], raw['w2'], raw['wA'], raw['wB'], raw['w4']
    b1, b2, bA, bB, b4 = raw['b1'], raw['b2'], raw['bA'], raw['bB'], raw['b4']

    x1 = jax.nn.relu(jnp.einsum('nhwc,cm->nhwm', x, w1) + b1)
    xp1 = x1.mean(axis=1)    # (N, W, Cm)  pool over H
    xp2 = x1.mean(axis=2)    # (N, H, Cm)  pool over W

    yp = jnp.pad(xp1, ((0, 0), (1, 1), (0, 0)))
    x2 = (jnp.einsum('nwc,cm->nwm', yp[:, :-2], w2[0])
          + jnp.einsum('nwc,cm->nwm', yp[:, 1:-1], w2[1])
          + jnp.einsum('nwc,cm->nwm', yp[:, 2:], w2[2]) + b2)
    out7 = jnp.concatenate(
        [x2] + [jax.nn.relu(jnp.einsum('nwc,cm->nwm', xp1, wA[i]) + bA[i])
                for i in range(4)], axis=-1)

    x2_1 = jnp.einsum('nhc,cm->nhm', xp2, w2[1]) + b2   # width-1 strip: center tap
    out8 = jnp.concatenate(
        [x2_1] + [jax.nn.relu(jnp.einsum('nhc,cm->nhm', xp2, wB[i]) + bB[i])
                  for i in range(4)], axis=-1)

    x78 = out7[:, None, :, :] + out8[:, :, None, :]
    x9 = jax.nn.relu(jnp.einsum('nhwf,fc->nhwc', x78, w4) + b4)   # conv4 has ReLU
    out = x * jax.nn.sigmoid(x9)
    return jnp.transpose(out, (0, 3, 1, 2))


if __name__ == "__main__":
    N, C, H, W = 2, 16, 16, 16          # in_channels=16 -> inter_channels=4
    key = jax.random.PRNGKey(0)
    kx, kp = jax.random.split(key)
    x = jax.random.normal(kx, (N, C, H, W), jnp.float32)

    raw = init_raw_weights(kp, C)
    params = pack_params(raw, H, W)

    out = strip_pooling(x, params)
    out = jax.block_until_ready(out)

    ref = ref_forward(x, raw)
    np.testing.assert_allclose(np.asarray(out), np.asarray(ref),
                               rtol=1e-4, atol=1e-5)
    assert out.shape == (N, C, H, W)
    print("KERNEL_OK")
</pallas_src>

<mosaic_0001>
module attributes {stable_mosaic.version = 11 : i64} {
  func.func @strip_pooling_kernel(%arg0: i32, %arg1: memref<1x16x256xf32, #tpu.memory_space<vmem>>, %arg2: memref<4x16xf32, #tpu.memory_space<vmem>>, %arg3: memref<4x1xf32, #tpu.memory_space<vmem>>, %arg4: memref<256x16xf32, #tpu.memory_space<vmem>>, %arg5: memref<256x16xf32, #tpu.memory_space<vmem>>, %arg6: memref<20x4xf32, #tpu.memory_space<vmem>>, %arg7: memref<20x1xf32, #tpu.memory_space<vmem>>, %arg8: memref<4x4xf32, #tpu.memory_space<vmem>>, %arg9: memref<4x4xf32, #tpu.memory_space<vmem>>, %arg10: memref<16x16xf32, #tpu.memory_space<vmem>>, %arg11: memref<16x16xf32, #tpu.memory_space<vmem>>, %arg12: memref<20x4xf32, #tpu.memory_space<vmem>>, %arg13: memref<20x1xf32, #tpu.memory_space<vmem>>, %arg14: memref<16x20xf32, #tpu.memory_space<vmem>>, %arg15: memref<16x1xf32, #tpu.memory_space<vmem>>, %arg16: memref<16x256xf32, #tpu.memory_space<vmem>>, %arg17: memref<16x256xf32, #tpu.memory_space<vmem>>, %arg18: memref<1x16x256xf32, #tpu.memory_space<vmem>>) attributes {dimension_semantics = [#tpu.dimension_semantics<parallel>], iteration_bounds = array<i64: 2>, scalar_prefetch = 0 : i64, scratch_operands = 0 : i64, tpu.core_type = #tpu.core_type<tc>, window_params = [{transform_indices = @transform_0, window_bounds = array<i64: 1, 16, 256>}, {pipeline_mode = #tpu.pipeline_mode<synchronous>, transform_indices = @transform_1, window_bounds = array<i64: 4, 16>}, {pipeline_mode = #tpu.pipeline_mode<synchronous>, transform_indices = @transform_2, window_bounds = array<i64: 4, 1>}, {pipeline_mode = #tpu.pipeline_mode<synchronous>, transform_indices = @transform_3, window_bounds = array<i64: 256, 16>}, {pipeline_mode = #tpu.pipeline_mode<synchronous>, transform_indices = @transform_4, window_bounds = array<i64: 256, 16>}, {pipeline_mode = #tpu.pipeline_mode<synchronous>, transform_indices = @transform_5, window_bounds = array<i64: 20, 4>}, {pipeline_mode = #tpu.pipeline_mode<synchronous>, transform_indices = @transform_6, window_bounds = array<i64: 20, 1>}, {pipeline_mode = #tpu.pipeline_mode<synchronous>, transform_indices = @transform_7, window_bounds = array<i64: 4, 4>}, {pipeline_mode = #tpu.pipeline_mode<synchronous>, transform_indices = @transform_8, window_bounds = array<i64: 4, 4>}, {pipeline_mode = #tpu.pipeline_mode<synchronous>, transform_indices = @transform_9, window_bounds = array<i64: 16, 16>}, {pipeline_mode = #tpu.pipeline_mode<synchronous>, transform_indices = @transform_10, window_bounds = array<i64: 16, 16>}, {pipeline_mode = #tpu.pipeline_mode<synchronous>, transform_indices = @transform_11, window_bounds = array<i64: 20, 4>}, {pipeline_mode = #tpu.pipeline_mode<synchronous>, transform_indices = @transform_12, window_bounds = array<i64: 20, 1>}, {pipeline_mode = #tpu.pipeline_mode<synchronous>, transform_indices = @transform_13, window_bounds = array<i64: 16, 20>}, {pipeline_mode = #tpu.pipeline_mode<synchronous>, transform_indices = @transform_14, window_bounds = array<i64: 16, 1>}, {pipeline_mode = #tpu.pipeline_mode<synchronous>, transform_indices = @transform_15, window_bounds = array<i64: 16, 256>}, {pipeline_mode = #tpu.pipeline_mode<synchronous>, transform_indices = @transform_16, window_bounds = array<i64: 16, 256>}, {transform_indices = @transform_17, window_bounds = array<i64: 1, 16, 256>}]} {
    %c0 = arith.constant 0 : index
    %c0_0 = arith.constant 0 : index
    %c0_1 = arith.constant 0 : index
    %0 = vector.load %arg1[%c0, %c0_0, %c0_1] : memref<1x16x256xf32, #tpu.memory_space<vmem>>, vector<1x16x256xf32>
    %1 = vector.shape_cast %0 : vector<1x16x256xf32> to vector<16x256xf32>
    %c0_2 = arith.constant 0 : index
    %c0_3 = arith.constant 0 : index
    %2 = vector.load %arg2[%c0_2, %c0_3] : memref<4x16xf32, #tpu.memory_space<vmem>>, vector<4x16xf32>
    %cst = arith.constant dense<0.000000e+00> : vector<4x256xf32>
    %3 = tpu.matmul %2, %1, %cst {dimension_numbers = #tpu.dot_dimension_numbers<[1], [0], [0], [1], [0, 0, 1, 1], [], []>} : vector<4x16xf32>, vector<16x256xf32>, vector<4x256xf32> -> vector<4x256xf32>
    %c0_4 = arith.constant 0 : index
    %c0_5 = arith.constant 0 : index
    %4 = vector.load %arg3[%c0_4, %c0_5] : memref<4x1xf32, #tpu.memory_space<vmem>>, vector<4x1xf32>
    %5 = vector.broadcast %4 : vector<4x1xf32> to vector<4x256xf32>
    %6 = arith.addf %3, %5 : vector<4x256xf32>
    %cst_6 = arith.constant 0.000000e+00 : f32
    %7 = vector.broadcast %cst_6 : f32 to vector<4x256xf32>
    %8 = arith.maximumf %6, %7 : vector<4x256xf32>
    %c0_7 = arith.constant 0 : index
    %c0_8 = arith.constant 0 : index
    %9 = vector.load %arg4[%c0_7, %c0_8] : memref<256x16xf32, #tpu.memory_space<vmem>>, vector<256x16xf32>
    %cst_9 = arith.constant dense<0.000000e+00> : vector<4x16xf32>
    %10 = tpu.matmul %8, %9, %cst_9 {dimension_numbers = #tpu.dot_dimension_numbers<[1], [0], [0], [1], [0, 0, 1, 1], [], []>} : vector<4x256xf32>, vector<256x16xf32>, vector<4x16xf32> -> vector<4x16xf32>
    %c0_10 = arith.constant 0 : index
    %c0_11 = arith.constant 0 : index
    %11 = vector.load %arg5[%c0_10, %c0_11] : memref<256x16xf32, #tpu.memory_space<vmem>>, vector<256x16xf32>
    %cst_12 = arith.constant dense<0.000000e+00> : vector<4x16xf32>
    %12 = tpu.matmul %8, %11, %cst_12 {dimension_numbers = #tpu.dot_dimension_numbers<[1], [0], [0], [1], [0, 0, 1, 1], [], []>} : vector<4x256xf32>, vector<256x16xf32>, vector<4x16xf32> -> vector<4x16xf32>
    %c0_13 = arith.constant 0 : index
    %c0_14 = arith.constant 0 : index
    %13 = vector.load %arg6[%c0_13, %c0_14] : memref<20x4xf32, #tpu.memory_space<vmem>>, vector<20x4xf32>
    %cst_15 = arith.constant dense<0.000000e+00> : vector<20x16xf32>
    %14 = tpu.matmul %13, %10, %cst_15 {dimension_numbers = #tpu.dot_dimension_numbers<[1], [0], [0], [1], [0, 0, 1, 1], [], []>} : vector<20x4xf32>, vector<4x16xf32>, vector<20x16xf32> -> vector<20x16xf32>
    %c0_16 = arith.constant 0 : index
    %c0_17 = arith.constant 0 : index
    %15 = vector.load %arg7[%c0_16, %c0_17] : memref<20x1xf32, #tpu.memory_space<vmem>>, vector<20x1xf32>
    %16 = vector.broadcast %15 : vector<20x1xf32> to vector<20x16xf32>
    %17 = arith.addf %14, %16 : vector<20x16xf32>
    %c0_18 = arith.constant 0 : index
    %c0_19 = arith.constant 0 : index
    %18 = vector.load %arg8[%c0_18, %c0_19] : memref<4x4xf32, #tpu.memory_space<vmem>>, vector<4x4xf32>
    %cst_20 = arith.constant dense<0.000000e+00> : vector<4x16xf32>
    %19 = tpu.matmul %18, %10, %cst_20 {dimension_numbers = #tpu.dot_dimension_numbers<[1], [0], [0], [1], [0, 0, 1, 1], [], []>} : vector<4x4xf32>, vector<4x16xf32>, vector<4x16xf32> -> vector<4x16xf32>
    %c0_21 = arith.constant 0 : index
    %c0_22 = arith.constant 0 : index
    %20 = vector.load %arg9[%c0_21, %c0_22] : memref<4x4xf32, #tpu.memory_space<vmem>>, vector<4x4xf32>
    %cst_23 = arith.constant dense<0.000000e+00> : vector<4x16xf32>
    %21 = tpu.matmul %20, %10, %cst_23 {dimension_numbers = #tpu.dot_dimension_numbers<[1], [0], [0], [1], [0, 0, 1, 1], [], []>} : vector<4x4xf32>, vector<4x16xf32>, vector<4x16xf32> -> vector<4x16xf32>
    %c0_24 = arith.constant 0 : index
    %c0_25 = arith.constant 0 : index
    %22 = vector.load %arg10[%c0_24, %c0_25] : memref<16x16xf32, #tpu.memory_space<vmem>>, vector<16x16xf32>
    %cst_26 = arith.constant dense<0.000000e+00> : vector<4x16xf32>
    %23 = tpu.matmul %19, %22, %cst_26 {dimension_numbers = #tpu.dot_dimension_numbers<[1], [0], [0], [1], [0, 0, 1, 1], [], []>} : vector<4x16xf32>, vector<16x16xf32>, vector<4x16xf32> -> vector<4x16xf32>
    %c0_27 = arith.constant 0 : index
    %c0_28 = arith.constant 0 : index
    %24 = vector.load %arg11[%c0_27, %c0_28] : memref<16x16xf32, #tpu.memory_space<vmem>>, vector<16x16xf32>
    %cst_29 = arith.constant dense<0.000000e+00> : vector<4x16xf32>
    %25 = tpu.matmul %21, %24, %cst_29 {dimension_numbers = #tpu.dot_dimension_numbers<[1], [0], [0], [1], [0, 0, 1, 1], [], []>} : vector<4x16xf32>, vector<16x16xf32>, vector<4x16xf32> -> vector<4x16xf32>
    %26 = arith.addf %23, %25 : vector<4x16xf32>
    %27 = vector.extract_strided_slice %17 {offsets = [0, 0], sizes = [4, 16], strides = [1, 1]} : vector<20x16xf32> to vector<4x16xf32>
    %28 = arith.addf %27, %26 : vector<4x16xf32>
    %29 = vector.extract_strided_slice %17 {offsets = [4, 0], sizes = [16, 16], strides = [1, 1]} : vector<20x16xf32> to vector<16x16xf32>
    %cst_30 = arith.constant 0.000000e+00 : f32
    %30 = vector.broadcast %cst_30 : f32 to vector<16x16xf32>
    %31 = arith.maximumf %29, %30 : vector<16x16xf32>
    %32 = tpu.concatenate %28, %31 in 0 : vector<4x16xf32>, vector<16x16xf32> -> vector<20x16xf32>
    %c0_31 = arith.constant 0 : index
    %c0_32 = arith.constant 0 : index
    %33 = vector.load %arg12[%c0_31, %c0_32] : memref<20x4xf32, #tpu.memory_space<vmem>>, vector<20x4xf32>
    %cst_33 = arith.constant dense<0.000000e+00> : vector<20x16xf32>
    %34 = tpu.matmul %33, %12, %cst_33 {dimension_numbers = #tpu.dot_dimension_numbers<[1], [0], [0], [1], [0, 0, 1, 1], [], []>} : vector<20x4xf32>, vector<4x16xf32>, vector<20x16xf32> -> vector<20x16xf32>
    %c0_34 = arith.constant 0 : index
    %c0_35 = arith.constant 0 : index
    %35 = vector.load %arg13[%c0_34, %c0_35] : memref<20x1xf32, #tpu.memory_space<vmem>>, vector<20x1xf32>
    %36 = vector.broadcast %35 : vector<20x1xf32> to vector<20x16xf32>
    %37 = arith.addf %34, %36 : vector<20x16xf32>
    %38 = vector.extract_strided_slice %37 {offsets = [0, 0], sizes = [4, 16], strides = [1, 1]} : vector<20x16xf32> to vector<4x16xf32>
    %39 = vector.extract_strided_slice %37 {offsets = [4, 0], sizes = [16, 16], strides = [1, 1]} : vector<20x16xf32> to vector<16x16xf32>
    %cst_36 = arith.constant 0.000000e+00 : f32
    %40 = vector.broadcast %cst_36 : f32 to vector<16x16xf32>
    %41 = arith.maximumf %39, %40 : vector<16x16xf32>
    %42 = tpu.concatenate %38, %41 in 0 : vector<4x16xf32>, vector<16x16xf32> -> vector<20x16xf32>
    %c0_37 = arith.constant 0 : index
    %c0_38 = arith.constant 0 : index
    %43 = vector.load %arg14[%c0_37, %c0_38] : memref<16x20xf32, #tpu.memory_space<vmem>>, vector<16x20xf32>
    %cst_39 = arith.constant dense<0.000000e+00> : vector<16x16xf32>
    %44 = tpu.matmul %43, %32, %cst_39 {dimension_numbers = #tpu.dot_dimension_numbers<[1], [0], [0], [1], [0, 0, 1, 1], [], []>} : vector<16x20xf32>, vector<20x16xf32>, vector<16x16xf32> -> vector<16x16xf32>
    %c0_40 = arith.constant 0 : index
    %c0_41 = arith.constant 0 : index
    %45 = vector.load %arg14[%c0_40, %c0_41] : memref<16x20xf32, #tpu.memory_space<vmem>>, vector<16x20xf32>
    %cst_42 = arith.constant dense<0.000000e+00> : vector<16x16xf32>
    %46 = tpu.matmul %45, %42, %cst_42 {dimension_numbers = #tpu.dot_dimension_numbers<[1], [0], [0], [1], [0, 0, 1, 1], [], []>} : vector<16x20xf32>, vector<20x16xf32>, vector<16x16xf32> -> vector<16x16xf32>
    %c0_43 = arith.constant 0 : index
    %c0_44 = arith.constant 0 : index
    %47 = vector.load %arg16[%c0_43, %c0_44] : memref<16x256xf32, #tpu.memory_space<vmem>>, vector<16x256xf32>
    %cst_45 = arith.constant dense<0.000000e+00> : vector<16x256xf32>
    %48 = tpu.matmul %44, %47, %cst_45 {dimension_numbers = #tpu.dot_dimension_numbers<[1], [0], [0], [1], [0, 0, 1, 1], [], []>} : vector<16x16xf32>, vector<16x256xf32>, vector<16x256xf32> -> vector<16x256xf32>
    %c0_46 = arith.constant 0 : index
    %c0_47 = arith.constant 0 : index
    %49 = vector.load %arg17[%c0_46, %c0_47] : memref<16x256xf32, #tpu.memory_space<vmem>>, vector<16x256xf32>
    %cst_48 = arith.constant dense<0.000000e+00> : vector<16x256xf32>
    %50 = tpu.matmul %46, %49, %cst_48 {dimension_numbers = #tpu.dot_dimension_numbers<[1], [0], [0], [1], [0, 0, 1, 1], [], []>} : vector<16x16xf32>, vector<16x256xf32>, vector<16x256xf32> -> vector<16x256xf32>
    %51 = arith.addf %48, %50 : vector<16x256xf32>
    %c0_49 = arith.constant 0 : index
    %c0_50 = arith.constant 0 : index
    %52 = vector.load %arg15[%c0_49, %c0_50] : memref<16x1xf32, #tpu.memory_space<vmem>>, vector<16x1xf32>
    %53 = vector.broadcast %52 : vector<16x1xf32> to vector<16x256xf32>
    %54 = arith.addf %51, %53 : vector<16x256xf32>
    %cst_51 = arith.constant 0.000000e+00 : f32
    %55 = vector.broadcast %cst_51 : f32 to vector<16x256xf32>
    %56 = arith.maximumf %54, %55 : vector<16x256xf32>
    %57 = arith.negf %56 : vector<16x256xf32>
    %58 = math.exp %57 : vector<16x256xf32>
    %cst_52 = arith.constant 1.000000e+00 : f32
    %59 = vector.broadcast %cst_52 : f32 to vector<16x256xf32>
    %60 = arith.addf %59, %58 : vector<16x256xf32>
    %61 = arith.divf %59, %60 : vector<16x256xf32>
    %62 = arith.mulf %1, %61 : vector<16x256xf32>
    %c0_53 = arith.constant 0 : index
    %c0_54 = arith.constant 0 : index
    %c0_55 = arith.constant 0 : index
    %63 = vector.load %arg18[%c0_53, %c0_54, %c0_55] : memref<1x16x256xf32, #tpu.memory_space<vmem>>, vector<1x16x256xf32>
    %64 = vector.shape_cast %63 : vector<1x16x256xf32> to vector<16x256xf32>
    %65 = vector.shape_cast %62 : vector<16x256xf32> to vector<1x16x256xf32>
    tpu.vector_store %arg18[%c0_53, %c0_54, %c0_55], %65 {strides = array<i32>} : memref<1x16x256xf32, #tpu.memory_space<vmem>>, vector<1x16x256xf32>,
    return
  }
  func.func @transform_0(%arg0: i32) -> (i32, i32, i32) {
    %c0_i32 = arith.constant 0 : i32
    %c0_i32_0 = arith.constant 0 : i32
    %c0_i32_1 = arith.constant 0 : i32
    return %arg0, %c0_i32, %c0_i32_0 : i32, i32, i32
  }
  func.func @transform_1(%arg0: i32) -> (i32, i32) {
    %c0_i32 = arith.constant 0 : i32
    %c0_i32_0 = arith.constant 0 : i32
    %c0_i32_1 = arith.constant 0 : i32
    return %c0_i32, %c0_i32_0 : i32, i32
  }
  func.func @transform_2(%arg0: i32) -> (i32, i32) {
    %c0_i32 = arith.constant 0 : i32
    %c0_i32_0 = arith.constant 0 : i32
    %c0_i32_1 = arith.constant 0 : i32
    return %c0_i32, %c0_i32_0 : i32, i32
  }
  func.func @transform_3(%arg0: i32) -> (i32, i32) {
    %c0_i32 = arith.constant 0 : i32
    %c0_i32_0 = arith.constant 0 : i32
    %c0_i32_1 = arith.constant 0 : i32
    return %c0_i32, %c0_i32_0 : i32, i32
  }
  func.func @transform_4(%arg0: i32) -> (i32, i32) {
    %c0_i32 = arith.constant 0 : i32
    %c0_i32_0 = arith.constant 0 : i32
    %c0_i32_1 = arith.constant 0 : i32
    return %c0_i32, %c0_i32_0 : i32, i32
  }
  func.func @transform_5(%arg0: i32) -> (i32, i32) {
    %c0_i32 = arith.constant 0 : i32
    %c0_i32_0 = arith.constant 0 : i32
    %c0_i32_1 = arith.constant 0 : i32
    return %c0_i32, %c0_i32_0 : i32, i32
  }
  func.func @transform_6(%arg0: i32) -> (i32, i32) {
    %c0_i32 = arith.constant 0 : i32
    %c0_i32_0 = arith.constant 0 : i32
    %c0_i32_1 = arith.constant 0 : i32
    return %c0_i32, %c0_i32_0 : i32, i32
  }
  func.func @transform_7(%arg0: i32) -> (i32, i32) {
    %c0_i32 = arith.constant 0 : i32
    %c0_i32_0 = arith.constant 0 : i32
    %c0_i32_1 = arith.constant 0 : i32
    return %c0_i32, %c0_i32_0 : i32, i32
  }
  func.func @transform_8(%arg0: i32) -> (i32, i32) {
    %c0_i32 = arith.constant 0 : i32
    %c0_i32_0 = arith.constant 0 : i32
    %c0_i32_1 = arith.constant 0 : i32
    return %c0_i32, %c0_i32_0 : i32, i32
  }
  func.func @transform_9(%arg0: i32) -> (i32, i32) {
    %c0_i32 = arith.constant 0 : i32
    %c0_i32_0 = arith.constant 0 : i32
    %c0_i32_1 = arith.constant 0 : i32
    return %c0_i32, %c0_i32_0 : i32, i32
  }
  func.func @transform_10(%arg0: i32) -> (i32, i32) {
    %c0_i32 = arith.constant 0 : i32
    %c0_i32_0 = arith.constant 0 : i32
    %c0_i32_1 = arith.constant 0 : i32
    return %c0_i32, %c0_i32_0 : i32, i32
  }
  func.func @transform_11(%arg0: i32) -> (i32, i32) {
    %c0_i32 = arith.constant 0 : i32
    %c0_i32_0 = arith.constant 0 : i32
    %c0_i32_1 = arith.constant 0 : i32
    return %c0_i32, %c0_i32_0 : i32, i32
  }
  func.func @transform_12(%arg0: i32) -> (i32, i32) {
    %c0_i32 = arith.constant 0 : i32
    %c0_i32_0 = arith.constant 0 : i32
    %c0_i32_1 = arith.constant 0 : i32
    return %c0_i32, %c0_i32_0 : i32, i32
  }
  func.func @transform_13(%arg0: i32) -> (i32, i32) {
    %c0_i32 = arith.constant 0 : i32
    %c0_i32_0 = arith.constant 0 : i32
    %c0_i32_1 = arith.constant 0 : i32
    return %c0_i32, %c0_i32_0 : i32, i32
  }
  func.func @transform_14(%arg0: i32) -> (i32, i32) {
    %c0_i32 = arith.constant 0 : i32
    %c0_i32_0 = arith.constant 0 : i32
    %c0_i32_1 = arith.constant 0 : i32
    return %c0_i32, %c0_i32_0 : i32, i32
  }
  func.func @transform_15(%arg0: i32) -> (i32, i32) {
    %c0_i32 = arith.constant 0 : i32
    %c0_i32_0 = arith.constant 0 : i32
    %c0_i32_1 = arith.constant 0 : i32
    return %c0_i32, %c0_i32_0 : i32, i32
  }
  func.func @transform_16(%arg0: i32) -> (i32, i32) {
    %c0_i32 = arith.constant 0 : i32
    %c0_i32_0 = arith.constant 0 : i32
    %c0_i32_1 = arith.constant 0 : i32
    return %c0_i32, %c0_i32_0 : i32, i32
  }
  func.func @transform_17(%arg0: i32) -> (i32, i32, i32) {
    %c0_i32 = arith.constant 0 : i32
    %c0_i32_0 = arith.constant 0 : i32
    %c0_i32_1 = arith.constant 0 : i32
    return %arg0, %c0_i32, %c0_i32_0 : i32, i32, i32
  }
}

</mosaic_0001>

<bundles_post_ra>
// kernel: tpu_custom_call.1
= control target key start
LH: loop header
LB: loop body
LE: loop exit
PB: predicated region body
PF: predicated region fallthrough
CT: control target
= control target key end

     0   :  { %s2028_s0 = inlined_call_operand.vmem [shape: f32[2,16,256], index: 0, kind: input, shape index: {}]   ;;  %s2029_s1 = inlined_call_operand.vmem [shape: f32[4,16], index: 1, kind: input, shape index: {}]   ;;  %s2030_s2 = inlined_call_operand.vmem [shape: f32[4,1], index: 2, kind: input, shape index: {}]   ;;  %s2031_s3 = inlined_call_operand.vmem [shape: f32[256,16], index: 3, kind: input, shape index: {}]   ;;  %s2032_s4 = inlined_call_operand.vmem [shape: f32[256,16], index: 4, kind: input, shape index: {}]   ;;  %s2033_s5 = inlined_call_operand.vmem [shape: f32[20,4], index: 5, kind: input, shape index: {}]   ;;  %s2034_s6 = inlined_call_operand.vmem [shape: f32[20,1], index: 6, kind: input, shape index: {}]   ;;  %s2035_s7 = inlined_call_operand.vmem [shape: f32[4,4], index: 7, kind: input, shape index: {}]   ;;  %s2036_s8 = inlined_call_operand.vmem [shape: f32[4,4], index: 8, kind: input, shape index: {}]   ;;  %s2037_s9 = inlined_call_operand.vmem [shape: f32[16,16], index: 9, kind: input, shape index: {}]   ;;  %s2038_s10 = inlined_call_operand.vmem [shape: f32[16,16], index: 10, kind: input, shape index: {}]   ;;  %s2039_s11 = inlined_call_operand.vmem [shape: f32[20,4], index: 11, kind: input, shape index: {}]   ;;  %s2040_s12 = inlined_call_operand.vmem [shape: f32[20,1], index: 12, kind: input, shape index: {}]   ;;  %s2041_s13 = inlined_call_operand.vmem [shape: f32[16,20], index: 13, kind: input, shape index: {}]   ;;  %s2042_s14 = inlined_call_operand.vmem [shape: f32[16,1], index: 14, kind: input, shape index: {}]   ;;  %s2043_s15 = inlined_call_operand.vmem [shape: f32[16,256], index: 15, kind: input, shape index: {}]   ;;  %s2044_s16 = inlined_call_operand.vmem [shape: f32[16,256], index: 16, kind: input, shape index: {}]   ;;  %s2045_s17 = inlined_call_operand.hbm [shape: f32[2,16,256], index: 17, kind: output, shape index: {}]  }
   0x1   :  { %2054 = sst [smem:[#allocation12_spill]] %s2028_s0 }
   0x2   :  { %2055 = sst [smem:[#allocation13_spill]] %s2029_s1 }
   0x3   :  { %2056 = sst [smem:[#allocation14_spill]] %s2030_s2 }
   0x4   :  { %2057 = sst [smem:[#allocation15_spill]] %s2031_s3 }
   0x5   :  { %22 = vsyncpa [#allocation3], 0 }
   0x6   :  { %24 = vsyncpa [#allocation3 + $0x1], 0  ;;  %s1596_s24 = smov 0   ;;  %s1598_s25 = smov 0  }
   0x7   :  { %s1600_s26 = smov 0   ;;  %s1602_s27 = smov 0  }
   0x8 LB: > { %2058 = sst [smem:[#allocation5_spill]] %s1489_s24  ;;  %s1617_s28 = sadd.s32 4294967295, %s1501_s27   ;;  %s1501_s27 = sphi %s1602_s27, %s2075_s27   ;;  %s1497_s26 = sphi %s1600_s26, %s2077_s26   ;;  %s1493_s25 = sphi %s1598_s25, %s2079_s25   ;;  %s1489_s24 = sphi %s1596_s24, %s2078_s24  }
   0x9   : > { %2059 = sst [smem:[#allocation6_spill]] %s1497_s26  ;;  %s1330_s29 = sadd.s32 4294967294, %s1501_s27  }
   0xa   : > { %2060 = sst [smem:[#allocation7_spill]] %s1501_s27  ;;  %s1621_s0 = sadd.s32 1, %s1501_s27  }
   0xb   : > { %2061 = sst [smem:[#allocation8_spill]] %s1621_s0  ;;  %s399_s30 = sadd.s32 1, %s1497_s26 }
   0xc   : > { %s396_s18 = ssub.s32 %s1501_s27, %s1621_s0  ;;  %p409_p0 = scmp.ne.s32.totalorder %s1497_s26, %s1493_s25 }
   0xd   : > { %p397_p1 = scmp.eq.s32.totalorder %s396_s18, 0  ;;  %p410_p2 = scmp.eq.s32.totalorder %s1617_s28, 1 }
   0xe   : > { %p415_p3 = scmp.ne.s32.totalorder %s1493_s25, %s1489_s24  ;;  %p416_p4 = scmp.eq.s32.totalorder %s1330_s29, 1 }
   0xf   : > { %s1632_s19 = scalar_select %p397_p1, %s1497_s26, %s399_s30  }
  0x10   : > { %p1634_p5 = por %p410_p2, %p409_p0  ;;  %p1638_p6 = por %p416_p4, %p415_p3 }
  0x11   : > { %2062 = sst [smem:[#allocation9_spill]] %s1632_s19  ;;  %p1333_p7 = scmp.ge.s32.totalorder %s1501_s27, 1 }
  0x12   : > { %s2063_s1 = scalar_select %p1634_p5, 1, 0 }
  0x13   : > { %s2065_s20 = scalar_select %p1638_p6, 1, 0 }
  0x14   : > { %2064 = sst [smem:[#allocation10_spill]] %s2063_s1  ;;  %p490_p8 = scmp.lt.s32.totalorder %s1501_s27, 3 }
  0x15   : > { %2066 = sst [smem:[#allocation11_spill]] %s2065_s20 }
  0x16   : > { %p491_p9 = pnand %p1333_p7, %p490_p8 }
  0x17   : > { %p542_p10 = scmp.lt.s32.totalorder (!%p491_p9), %s1617_s28, 1  ;;  %s2067_s2 = sld [smem:[#allocation14_spill]] (!%p491_p9) }
  0x18   : > { %494 = sbr.rel (%p491_p9) target bundleno = 886 (0x376), region = 88  ;;  %s2068_s3 = sld [smem:[#allocation15_spill]] (!%p491_p9) }
  0x19   : > { %s2069_s29 = sld [smem:[#allocation12_spill]] (!%p491_p9)  ;;  %s1377_s24 = sshll.u32 (!%p491_p9), %s1617_s28, 5 }
  0x1a   : > { %s2070_s26 = sld [smem:[#allocation13_spill]] (!%p491_p9)  ;;  %s1264_s0 = scalar_lea.hbm (!%p491_p9), %s2045_s17, %s1377_s24 }
  0x1b   : > { %s1267_s27 = sshll.u32 (!%p491_p9), %s1264_s0, 4  ;;  %s1268_s27 = int_to_ptr.hbm [resolvable:$true] %s1267_s27 }
  0x1d   : > { %v1503_v0 = vmov 0   ;;  %v552_v1 = vld [vmem:[%s2067_s2] sm:$0xf]  ;;  %s543_s23 = scalar_select %p542_p10, %s1617_s28, 1  ;;  %v691_v3 = vld [vmem:[%s2032_s4 + $0x78] sm:$0xff]  ;;  %v690_v5 = vld [vmem:[%s2032_s4 + $0x70] sm:$0xff] }
  0x1e   : > { %1420 = vset.pattern.permute.xlu0 %v1503_v0  ;;  %1421 = vset.pattern.permute.xlu1 %v1503_v0  ;;  %v635_v2 = vld [vmem:[%s2068_s3 + $0xf8] sm:$0xff]  ;;  %v634_v4 = vld [vmem:[%s2068_s3 + $0xf0] sm:$0xff]  ;;  %v633_v6 = vld [vmem:[%s2068_s3 + $0xe8] sm:$0xff]  ;;  %vm558_vm0 = vcmask 130048   ;;  %vm779_vm1 = vcmask 1043456   ;;  %vm769_vm2 = vcmask 31744  }
  0x1f   : > { %555 = vperm.xlu0 %1420, %v552_v1   ;;  %1422 = vset.pattern.permute.xlu2 %v1503_v0  ;;  %s1376_s2 = sshll.u32 %s543_s23, 5  ;;  %v689_v7 = vld [vmem:[%s2032_s4 + $0x68] sm:$0xff]  ;;  %v917_v13 = vld [vmem:[%s2040_s12 + $0x10] sm:$0xf]  ;;  %v619_v14 = vld [vmem:[%s2068_s3 + $0x78] sm:$0xff]  ;;  %vm977_vm3 = vcmask 162816  }
  0x20   : > { %656 = vmatpush.msra.mxu3 %v635_v2  ;;  %708 = vmatpush.msra.mxu0 %v691_v3  ;;  %s546_s30 = scalar_lea.vmem %s2069_s29, %s1376_s2  ;;  %v551_v11 = vld [vmem:[%s2070_s26] sm:$0xf]  ;;  %v707_v15 = vld [vmem:[%s2032_s4 + $0xf8] sm:$0xff]  ;;  %v618_v17 = vld [vmem:[%s2068_s3 + $0x70] sm:$0xff]  ;;  %s1453_s23 = sshra.s32 %s1268_s27, 4  ;;  %s1454_s23 = int_to_ptr.hbm [resolvable:$true] %s1453_s23 }
  0x21   : > { %v1670_v8 = vld [vmem:[%s546_s30 + $0x10] sm:$0xff]  ;;  %v1672_v9 = vld [vmem:[%s546_s30] sm:$0xff]  ;;  %v1674_v10 = vld [vmem:[%s546_s30 + $0x18] sm:$0xff]  ;;  %s1455_s21 = scalar_lea.hbm %s1454_s23, 32  ;;  %p1460_p0 = scmp.lt.s32.totalorder %s1454_s23, %s2045_s17 }
  0x22   : > { %657 = vmatpush.msra.mxu3 %v634_v4  ;;  %709 = vmatpush.msra.mxu0 %v690_v5  ;;  %v1681_v12 = vld [vmem:[%s546_s30 + $0x8] sm:$0xff]  ;;  %v632_v16 = vld [vmem:[%s2068_s3 + $0xe0] sm:$0xff]  ;;  %v706_v19 = vld [vmem:[%s2032_s4 + $0xf0] sm:$0xff]  ;;  %s539_s30 = sand.u32 1, %s1493_s25   ;;  %p1456_p11 = scmp.ne.s32.totalorder %s1454_s23, %s1455_s21 }
  0x23   : > { %576 = vmatpush.msra.mxu2 %v1670_v8  ;;  %596 = vmatpush.msra.mxu1 %v1674_v10  ;;  %v688_v18 = vld [vmem:[%s2032_s4 + $0x60] sm:$0xff]  ;;  %v631_v20 = vld [vmem:[%s2068_s3 + $0xd8] sm:$0xff]  ;;  %v617_v21 = vld [vmem:[%s2068_s3 + $0x68] sm:$0xff]  ;;  %s1334_s19 = sshll.u32 %s539_s30, 5  ;;  %s1253_s20 = scalar_lea.sflag [#allocation3], %s539_s30 }
  0x24   : > { %658 = vmatpush.msra.mxu3 %v633_v6  ;;  %710 = vmatpush.msra.mxu0 %v689_v7  ;;  %v687_v22 = vld [vmem:[%s2032_s4 + $0x58] sm:$0xff]  ;;  %v705_v23 = vld [vmem:[%s2032_s4 + $0xe8] sm:$0xff]  ;;  %v630_v24 = vld [vmem:[%s2068_s3 + $0xd0] sm:$0xff]  ;;  %s1985_s18 = scalar_lea.vmem [#allocation2], %s1334_s19  ;;  %p1457_p12 = pnand %p1456_p11, %p1634_p5 }
  0x25   : > { %577 = vmatpush.msra.mxu2 %v1672_v9  ;;  %597 = vmatpush.msra.mxu1 %v1681_v12  ;;  %v616_v25 = vld [vmem:[%s2068_s3 + $0x60] sm:$0xff]  ;;  %v686_v26 = vld [vmem:[%s2032_s4 + $0x50] sm:$0xff]  ;;  %v615_v29 = vld [vmem:[%s2068_s3 + $0x58] sm:$0xff]  ;;  %s1265_s28 = sshll.u32 %s1985_s18, 4  ;;  %s1459_s19 = scalar_lea.hbm %s2045_s17, 64  ;;  %s1266_s28 = int_to_ptr.vmem [resolvable:$true] %s1265_s28 }
  0x26   : > { %1337 = vmatmul.msk.f32.vlgmr.msra.gmra.mxu2 %vm558_vm0, %v551_v11  ;;  %1338 = vmatmul.msk.f32.vlgmr.msra.gmra.mxu1 %vm558_vm0, %v551_v11  ;;  %v704_v27 = vld [vmem:[%s2032_s4 + $0xe0] sm:$0xff]  ;;  %v703_v30 = vld [vmem:[%s2032_s4 + $0xd8] sm:$0xff]  ;;  %v614_v31 = vld [vmem:[%s2068_s3 + $0x50] sm:$0xff]  ;;  %p1458_p13 = pneg %p1457_p12  ;;  %p1461_p1 = scmp.lt.s32.totalorder %s1459_s19, %s1455_s21 }
  0x27   : > { %930 = vperm.xlu0 %1420, %v917_v13   ;;  %636 = vmatpush.msrb.mxu2 %v619_v14  ;;  %v751_v28 = vld [vmem:[%s2034_s6] sm:$0xff]  ;;  %v702_v32 = vld [vmem:[%s2032_s4 + $0xd0] sm:$0xff]  ;;  %v613_v33 = vld [vmem:[%s2068_s3 + $0x48] sm:$0xff] }
  0x28   : > { %728 = vmatpush.msrb.mxu1 %v707_v15  ;;  %659 = vmatpush.msra.mxu3 %v632_v16  ;;  %v629_v34 = vld [vmem:[%s2068_s3 + $0xc8] sm:$0xff]  ;;  %v612_v37 = vld [vmem:[%s2068_s3 + $0x40] sm:$0xff]  ;;  %v627_v41 = vld [vmem:[%s2068_s3 + $0xb8] sm:$0xff]  ;;  %p1462_p2 = por %p1461_p1, %p1460_p0 }
  0x29   : > { %637 = vmatpush.msrb.mxu2 %v618_v17  ;;  %711 = vmatpush.msra.mxu0 %v688_v18  ;;  %v685_v35 = vld [vmem:[%s2032_s4 + $0x48] sm:$0xff]  ;;  %v628_v38 = vld [vmem:[%s2068_s3 + $0xc0] sm:$0xff]  ;;  %v611_v42 = vld [vmem:[%s2068_s3 + $0x38] sm:$0xff] }
  0x2a   : > { %729 = vmatpush.msrb.mxu1 %v706_v19  ;;  %660 = vmatpush.msra.mxu3 %v631_v20  ;;  %v701_v36 = vld [vmem:[%s2032_s4 + $0xc8] sm:$0xff]  ;;  %v684_v39 = vld [vmem:[%s2032_s4 + $0x40] sm:$0xff]  ;;  %v683_v43 = vld [vmem:[%s2032_s4 + $0x38] sm:$0xff]  ;;  %p1463_p3 = pnand %p1462_p2, %p1458_p13 }
  0x2b   : > { %638 = vmatpush.msrb.mxu2 %v617_v21  ;;  %712 = vmatpush.msra.mxu0 %v687_v22  ;;  %v700_v40 = vld [vmem:[%s2032_s4 + $0xc0] sm:$0xff]  ;;  %v699_v44 = vld [vmem:[%s2032_s4 + $0xb8] sm:$0xff]  ;;  %v626_v45 = vld [vmem:[%s2068_s3 + $0xb0] sm:$0xff] }
  0x2c   : > { %730 = vmatpush.msrb.mxu1 %v705_v23  ;;  %661 = vmatpush.msra.mxu3 %v630_v24  ;;  %v682_v46 = vld [vmem:[%s2032_s4 + $0x30] sm:$0xff]  ;;  %v609_v49 = vld [vmem:[%s2068_s3 + $0x28] sm:$0xff]  ;;  %v608_v53 = vld [vmem:[%s2068_s3 + $0x20] sm:$0xff] }
  0x2d   : > { %639 = vmatpush.msrb.mxu2 %v616_v25  ;;  %713 = vmatpush.msra.mxu0 %v686_v26  ;;  %v610_v47 = vld [vmem:[%s2068_s3 + $0x30] sm:$0xff]  ;;  %v625_v50 = vld [vmem:[%s2068_s3 + $0xa8] sm:$0xff]  ;;  %v624_v54 = vld [vmem:[%s2068_s3 + $0xa0] sm:$0xff] }
  0x2e   : > { %731 = vmatpush.msrb.mxu1 %v704_v27  ;;  %662 = vmatpush.msra.mxu3 %v629_v34  ;;  %v698_v48 = vld [vmem:[%s2032_s4 + $0xb0] sm:$0xff]  ;;  %v681_v51 = vld [vmem:[%s2032_s4 + $0x28] sm:$0xff]  ;;  %v680_v55 = vld [vmem:[%s2032_s4 + $0x20] sm:$0xff] }
  0x2f   : > { %756 = vperm.xlu0 %1420, %v751_v28   ;;  %640 = vmatpush.msrb.mxu2 %v615_v29  ;;  %v697_v52 = vld [vmem:[%s2032_s4 + $0xa8] sm:$0xff]  ;;  %v696_v56 = vld [vmem:[%s2032_s4 + $0xa0] sm:$0xff]  ;;  %v623_v57 = vld [vmem:[%s2068_s3 + $0x98] sm:$0xff] }
  0x30   : > { %732 = vmatpush.msrb.mxu1 %v703_v30  ;;  %714 = vmatpush.msra.mxu0 %v685_v35  ;;  %v607_v58 = vld [vmem:[%s2068_s3 + $0x18] sm:$0xff]  ;;  %v622_v61 = vld [vmem:[%s2068_s3 + $0x90] sm:$0xff]  ;;  %v605_v1 = vld [vmem:[%s2068_s3 + $0x8] sm:$0xff] }
  0x31   : > { %641 = vmatpush.msrb.mxu2 %v614_v31  ;;  %663 = vmatpush.msra.mxu3 %v628_v38  ;;  %v679_v59 = vld [vmem:[%s2032_s4 + $0x18] sm:$0xff]  ;;  %v678_v62 = vld [vmem:[%s2032_s4 + $0x10] sm:$0xff]  ;;  %v621_v2 = vld [vmem:[%s2068_s3 + $0x88] sm:$0xff] }
  0x32   : > { %733 = vmatpush.msrb.mxu1 %v702_v32  ;;  %715 = vmatpush.msra.mxu0 %v684_v39  ;;  %v695_v60 = vld [vmem:[%s2032_s4 + $0x98] sm:$0xff]  ;;  %v606_v63 = vld [vmem:[%s2068_s3 + $0x10] sm:$0xff]  ;;  %v677_v3 = vld [vmem:[%s2032_s4 + $0x8] sm:$0xff] }
  0x33   : > { %642 = vmatpush.msrb.mxu2 %v613_v33  ;;  %664 = vmatpush.msra.mxu3 %v627_v41  ;;  %v694_v0 = vld [vmem:[%s2032_s4 + $0x90] sm:$0xff]  ;;  %v693_v4 = vld [vmem:[%s2032_s4 + $0x88] sm:$0xff]  ;;  %v604_v5 = vld [vmem:[%s2068_s3] sm:$0xff] }
  0x34   : > { %734 = vmatpush.msrb.mxu1 %v701_v36  ;;  %716 = vmatpush.msra.mxu0 %v683_v43  ;;  %v620_v6 = vld [vmem:[%s2068_s3 + $0x80] sm:$0xff]  ;;  %v916_v20 = vld [vmem:[%s2040_s12 + $0x8] sm:$0xff]  ;;  %v750_v32 = vld [vmem:[%s2033_s5 + $0x10] sm:$0xf] }
  0x35   : > { %643 = vmatpush.msrb.mxu2 %v612_v37  ;;  %665 = vmatpush.msra.mxu3 %v626_v45  ;;  %v676_v7 = vld [vmem:[%s2032_s4] sm:$0xff]  ;;  %v749_v30 = vld [vmem:[%s2033_s5 + $0x8] sm:$0xff]  ;;  %v914_v34 = vld [vmem:[%s2039_s11 + $0x10] sm:$0xf] }
  0x36   : > { %735 = vmatpush.msrb.mxu1 %v700_v40  ;;  %717 = vmatpush.msra.mxu0 %v682_v46  ;;  %v692_v11 = vld [vmem:[%s2032_s4 + $0x80] sm:$0xff]  ;;  %v913_v33 = vld [vmem:[%s2039_s11 + $0x8] sm:$0xff]  ;;  %v753_v41 = vld [vmem:[%s2034_s6 + $0x10] sm:$0xf] }
  0x37   : > { %644 = vmatpush.msrb.mxu2 %v611_v42  ;;  %666 = vmatpush.msra.mxu3 %v625_v50  ;;  %v748_v26 = vld [vmem:[%s2033_s5] sm:$0xff]  ;;  %v858_v36 = vld [vmem:[%s2037_s9 + $0x8] sm:$0xff] }
  0x38   : > { %736 = vmatpush.msrb.mxu1 %v699_v44  ;;  %718 = vmatpush.msra.mxu0 %v681_v51  ;;  %v809_v27 = vld [vmem:[%s2035_s7] sm:$0xf]  ;;  %v860_v38 = vld [vmem:[%s2038_s10 + $0x8] sm:$0xff] }
  0x39   : > { %645 = vmatpush.msrb.mxu2 %v610_v47  ;;  %667 = vmatpush.msra.mxu3 %v624_v54  ;;  %v833_v28 = vld [vmem:[%s2036_s8] sm:$0xf]  ;;  %v752_v42 = vld [vmem:[%s2034_s6 + $0x8] sm:$0xff] }
  0x3a   : > { %737 = vmatpush.msrb.mxu1 %v698_v48  ;;  %719 = vmatpush.msra.mxu0 %v680_v55  ;;  %v912_v31 = vld [vmem:[%s2039_s11] sm:$0xff]  ;;  %v1149_v44 = vld [vmem:[%s2042_s14 + $0x8] sm:$0xff] }
  0x3b   : > { %646 = vmatpush.msrb.mxu2 %v609_v49  ;;  %668 = vmatpush.msra.mxu3 %v623_v57  ;;  %v915_v35 = vld [vmem:[%s2040_s12] sm:$0xff] }
  0x3c   : > { %738 = vmatpush.msrb.mxu1 %v697_v52  ;;  %720 = vmatpush.msra.mxu0 %v679_v59  ;;  %v857_v37 = vld [vmem:[%s2037_s9] sm:$0xff] }
  0x3d   : > { %647 = vmatpush.msrb.mxu2 %v608_v53  ;;  %669 = vmatpush.msra.mxu3 %v622_v61  ;;  %v859_v39 = vld [vmem:[%s2038_s10] sm:$0xff] }
  0x3e   : > { %739 = vmatpush.msrb.mxu1 %v696_v56  ;;  %721 = vmatpush.msra.mxu0 %v678_v62  ;;  %v1148_v40 = vld [vmem:[%s2042_s14] sm:$0xff] }
  0x3f   : > { %648 = vmatpush.msrb.mxu2 %v607_v58  ;;  %670 = vmatpush.msra.mxu3 %v621_v2 }
  0x40   : > { %740 = vmatpush.msrb.mxu1 %v695_v60  ;;  %722 = vmatpush.msra.mxu0 %v677_v3 }
  0x41   : > { %649 = vmatpush.msrb.mxu2 %v606_v63  ;;  %671 = vmatpush.msra.mxu3 %v620_v6  ;;  %v1042_v6 = vld [vmem:[%s2044_s16 + $0x10] sm:$0xff] }
  0x42   : > { %741 = vmatpush.msrb.mxu1 %v694_v0  ;;  %723 = vmatpush.msra.mxu0 %v676_v7  ;;  %v1039_v7 = vld [vmem:[%s2043_s15 + $0x18] sm:$0xff] }
  0x43   : > { %650 = vmatpush.msrb.mxu2 %v605_v1  ;;  %925 = vperm.xlu1 %1421, %v916_v20  }
  0x44   : > { %742 = vmatpush.msrb.mxu1 %v693_v4  ;;  %766 = vperm.xlu2 %1422, %v753_v41   ;;  %v975_v4 = vld [vmem:[%s2041_s13] sm:$0xff] }
  0x45   : > { %651 = vmatpush.msrb.mxu2 %v604_v5  ;;  %v976_v5 = vld [vmem:[%s2041_s13 + $0x8] sm:$0xff] }
  0x46   : > { %743 = vmatpush.msrb.mxu1 %v692_v11  ;;  %v1038_v11 = vld [vmem:[%s2043_s15 + $0x10] sm:$0xff] }
  0x48   : > { %878 = vmatpush.msra.mxu1 %v860_v38 }
  0x4a   : > { %879 = vmatpush.msra.mxu1 %v859_v39 }
  0x4b   : > { %920 = vperm.xlu1 %1421, %v915_v35  }
  0x4c   : > { %761 = vperm.xlu2 %1422, %v752_v42  }
  0x53   : > { %1152 = vperm.xlu1 %1421, %v1148_v40  }
  0x54   : > { %1157 = vperm.xlu2 %1422, %v1149_v44  }
  0x91   : > { %v556_v13 = vpop.permute.xlu0 %555 }
  0x99   : > { %v931_v50 = vpop.permute.xlu0 %930 }
  0x9e   : > { %v767_v60 = vpop.permute.xlu2 %766 }
  0xa3   : > { %v599_v14 = vpop.f32.mrf.mxu1 }
  0xa4   : > { %v600_v15 = vadd.f32 %v599_v14, %v556_v13  ;;  %v757_v14 = vpop.permute.xlu0 %756 }
  0xa6   : > { %v603_v16 = vmax.f32 %v600_v15, 0.0  ;;  %v762_v1 = vpop.permute.xlu2 %761 }
  0xa8   : > { %672 = vmatmul.f32.vlgmr.msra.gmra.mxu3 %v603_v16  ;;  %744 = vmatmul.f32.vlgmr.msrb.gmra.mxu1 %v603_v16 }
  0xa9   : > { %v579_v17 = vpop.f32.mrf.mxu2 }
  0xaa   : > { %v580_v18 = vadd.f32 %v579_v17, %v556_v13  ;;  %v1040_v13 = vld [vmem:[%s2044_s16] sm:$0xff] }
  0xac   : > { %v602_v19 = vmax.f32 %v580_v18, 0.0 }
  0xae   : > { %652 = vmatmul.f32.vlgmr.msrb.gmra.mxu2 %v602_v19  ;;  %724 = vmatmul.f32.vlgmr.msra.gmra.mxu0 %v602_v19  ;;  %v1158_v44 = vpop.permute.xlu2 %1157 }
  0xb5   : > { %v926_v48 = vpop.permute.xlu1 %925 }
  0xbd   : > { %v921_v57 = vpop.permute.xlu1 %920 }
 0x125   : > { %v745_v24 = vpop.f32.mrf.mxu1 }
 0x12b   : > { %v673_v21 = vpop.f32.mrf.mxu3  ;;  %v725_v23 = vpop.f32.mrf.mxu0 }
 0x12c   : > { %v746_v29 = vadd.f32 %v745_v24, %v725_v23  ;;  %v1041_v23 = vld [vmem:[%s2044_s16 + $0x8] sm:$0xff]  ;;  %v1036_v24 = vld [vmem:[%s2043_s15] sm:$0xff] }
 0x131   : > { %v653_v22 = vpop.f32.mrf.mxu2 }
 0x132   : > { %v674_v25 = vadd.f32 %v673_v21, %v653_v22  ;;  %v1043_v22 = vld [vmem:[%s2044_s16 + $0x18] sm:$0xff] }
 0x134   : > { %1339 = vmatpush.msk.msra.mxu2 %vm779_vm1, %v674_v25  ;;  %1343 = vmatpush.msk.msrb.mxu3 %vm779_vm1, %v674_v25 }
 0x135   : > { %1345 = vmatpush.msk.msrb.mxu0 %vm779_vm1, %v674_v25  ;;  %1340 = vmatmul.msk.f32.vlgmr.msra.gmra.mxu2 %vm769_vm2, %v748_v26  ;;  %v1037_v25 = vld [vmem:[%s2043_s15 + $0x8] sm:$0xff] }
 0x136   : > { %1344 = vmatmul.msk.f32.vlgmr.msrb.gmra.mxu3 %vm769_vm2, %v809_v27  ;;  %1346 = vmatmul.msk.f32.vlgmr.msrb.gmra.mxu0 %vm769_vm2, %v833_v28 }
 0x137   : > { %1349 = vmatpush.msk.msra.mxu0 %vm779_vm1, %v746_v29  ;;  %901 = vmatpush.msra.mxu3 %v858_v36 }
 0x138   : > { %1064 = vmatpush.msrb.mxu2 %v1042_v6 }
 0x139   : > { %902 = vmatpush.msra.mxu3 %v857_v37  ;;  %1139 = vmatpush.msrb.mxu0 %v1039_v7 }
 0x13a   : > { %1065 = vmatpush.msrb.mxu2 %v1040_v13 }
 0x13b   : > { %1140 = vmatpush.msrb.mxu0 %v1037_v25 }
 0x13d   : > { %1341 = vmatmul.msk.f32.gmra.mxu2 %vm769_vm2, %v749_v30 }
 0x13e   : > { %1350 = vmatmul.msk.f32.vlgmr.msra.gmra.mxu0 %vm769_vm2, %v912_v31 }
 0x145   : > { %1342 = vmatmul.msk.f32.gmra.mxu2 %vm769_vm2, %v750_v32 }
 0x146   : > { %1351 = vmatmul.msk.f32.gmra.mxu0 %vm769_vm2, %v913_v33  ;;  %v1153_v33 = vpop.permute.xlu1 %1152 }
 0x14e   : > { %1352 = vmatmul.msk.f32.gmra.mxu0 %vm769_vm2, %v914_v34 }
 0x1b3   : > { %v854_v43 = vpop.f32.mrf.mxu0 }
 0x1b4   : > { %1347 = vmatmul.msk.f32.vlgmr.msra.gmra.mxu1 %vm558_vm0, %v854_v43 }
 0x1b8   : > { %v800_v55 = vpop.f32.mrf.mxu2 }
 0x1b9   : > { %v830_v45 = vpop.f32.mrf.mxu3  ;;  %v801_v16 = vadd.f32 %v800_v55, %v757_v14 }
 0x1ba   : > { %1348 = vmatmul.msk.f32.vlgmr.msra.gmra.mxu3 %vm558_vm0, %v830_v45 }
 0x1bb   : > { %v962_v46 = vpop.f32.mrf.mxu0  ;;  %v908_v19 = vmax.f32 %v801_v16, 0.0 }
 0x1bc   : > { %v963_v59 = vadd.f32 %v962_v46, %v921_v57 }
 0x1be   : > { %v971_v61 = vmax.f32 %v963_v59, 0.0 }
 0x1c0   : > { %v803_v56 = vpop.f32.mrf.mxu2  ;;  %v974_v63 = vsel %vm779_vm1, %v963_v59, %v971_v61 }
 0x1c1   : > { %v804_v2 = vadd.f32 %v803_v56, %v762_v1 }
 0x1c3   : > { %v965_v47 = vpop.f32.mrf.mxu0  ;;  %v909_v3 = vmax.f32 %v804_v2, 0.0 }
 0x1c4   : > { %v966_v49 = vadd.f32 %v965_v47, %v926_v48 }
 0x1c6   : > { %v972_v54 = vmax.f32 %v966_v49, 0.0 }
 0x1c8   : > { %v806_v58 = vpop.f32.mrf.mxu2 }
 0x1c9   : > { %v807_v62 = vadd.f32 %v806_v58, %v767_v60 }
 0x1cb   : > { %v968_v51 = vpop.f32.mrf.mxu0  ;;  %v910_v0 = vmax.f32 %v807_v62, 0.0 }
 0x1cc   : > { %v969_v52 = vadd.f32 %v968_v51, %v931_v50 }
 0x1cd   : > { %1353 = vmatpush.msk.msrb.mxu1 %vm779_vm1, %v910_v0 }
 0x1ce   : > { %v973_v53 = vmax.f32 %v969_v52, 0.0 }
 0x1cf   : > { %1001 = vmatpush.msrb.mxu1 %v909_v3 }
 0x1d0   : > { %1356 = vmatpush.msk.msrb.mxu3 %vm779_vm1, %v973_v53 }
 0x1d2   : > { %1027 = vmatpush.msrb.mxu3 %v972_v54 }
 0x1d4   : > { %1028 = vmatpush.msrb.mxu3 %v974_v63 }
 0x1d5   : > { %1357 = vmatmul.msk.f32.vlgmr.msrb.gmra.mxu3 %vm977_vm3, %v975_v4 }
 0x1d6   : > { %1116 = vmatpush.msra.mxu3 %v1038_v11 }
 0x1d8   : > { %1117 = vmatpush.msra.mxu3 %v1036_v24 }
 0x1dd   : > { %1358 = vmatmul.msk.f32.gmra.mxu3 %vm977_vm3, %v976_v5 }
 0x231   : > { %v881_v15 = vpop.f32.mrf.mxu1 }
 0x23d   : > { %v904_v17 = vpop.f32.mrf.mxu3 }
 0x23e   : > { %v905_v18 = vadd.f32 %v904_v17, %v881_v15 }
 0x240   : > { %v907_v20 = vadd.f32 %v905_v18, %v801_v16 }
 0x242   : > { %v911_v21 = vsel %vm779_vm1, %v907_v20, %v908_v19 }
 0x243   : > { %1002 = vmatpush.msrb.mxu1 %v911_v21 }
 0x244   : > { %1354 = vmatmul.msk.f32.vlgmr.msrb.gmra.mxu1 %vm977_vm3, %v975_v4 }
 0x245   : > { %1087 = vmatpush.msra.mxu1 %v1043_v22 }
 0x247   : > { %1088 = vmatpush.msra.mxu1 %v1041_v23 }
 0x24c   : > { %1355 = vmatmul.msk.f32.gmra.mxu1 %vm977_vm3, %v976_v5 }
 0x258   : > { %v1030_v26 = vpop.f32.mrf.mxu3 }
 0x259   : > { %1359 = vmatmul.msk.f32.vlgmr.msrb.gmra.mxu2 %vm558_vm0, %v1030_v26  ;;  %1361 = vmatmul.msk.f32.vlgmr.msra.gmra.mxu1 %vm558_vm0, %v1030_v26 }
 0x260   : > { %v1033_v27 = vpop.f32.mrf.mxu3 }
 0x261   : > { %1360 = vmatmul.msk.f32.gmra.mxu2 %vm558_vm0, %v1033_v27  ;;  %1362 = vmatmul.msk.f32.gmra.mxu1 %vm558_vm0, %v1033_v27 }
 0x2c1   : > { %v1004_v28 = vpop.f32.mrf.mxu1 }
 0x2c2   : > { %1363 = vmatmul.msk.f32.vlgmr.msra.gmra.mxu3 %vm558_vm0, %v1004_v28  ;;  %1365 = vmatmul.msk.f32.vlgmr.msrb.gmra.mxu0 %vm558_vm0, %v1004_v28 }
 0x2c9   : > { %v1007_v29 = vpop.f32.mrf.mxu1 }
 0x2ca   : > { %1364 = vmatmul.msk.f32.gmra.mxu3 %vm558_vm0, %v1007_v29  ;;  %1366 = vmatmul.msk.f32.gmra.mxu0 %vm558_vm0, %v1007_v29 }
 0x2d6   : > { %v1090_v30 = vpop.f32.mrf.mxu1 }
 0x2dc   : > { %v1067_v34 = vpop.f32.mrf.mxu2 }
 0x2de   : > { %v1093_v38 = vpop.f32.mrf.mxu1 }
 0x2e4   : > { %v1070_v47 = vpop.f32.mrf.mxu2 }
 0x33f   : > { %v1142_v31 = vpop.f32.mrf.mxu0 }
 0x340   : > { %v1143_v32 = vadd.f32 %v1142_v31, %v1090_v30 }
 0x342   : > { %v1161_v35 = vadd.f32 %v1153_v33, %v1143_v32 }
 0x344   : > { %v1165_v36 = vmax.f32 %v1161_v35, 0.0 }
 0x345   : > { %v1119_v37 = vpop.f32.mrf.mxu3 }
 0x346   : > { %v1368_v39 = vmul.f32 -1.442695, %v1165_v36  ;;  %v1120_v40 = vadd.f32 %v1119_v37, %v1067_v34 }
 0x347   : > { %v1145_v41 = vpop.f32.mrf.mxu0 }
 0x348   : > { %1423 = vpow2.f32 %v1368_v39  ;;  %v1160_v42 = vadd.f32 %v1153_v33, %v1120_v40  ;;  %v1146_v43 = vadd.f32 %v1145_v41, %v1093_v38 }
 0x34a   : > { %v1164_v45 = vmax.f32 %v1160_v42, 0.0  ;;  %v1163_v46 = vadd.f32 %v1158_v44, %v1146_v43 }
 0x34c   : > { %v1367_v48 = vmul.f32 -1.442695, %v1164_v45  ;;  %v1167_v49 = vmax.f32 %v1163_v46, 0.0 }
 0x34d   : > { %v1122_v50 = vpop.f32.mrf.mxu3 }
 0x34e   : > { %v1424_v51 = vpop.eup %1423  ;;  %1425 = vpow2.f32 %v1367_v48  ;;  %v1370_v52 = vmul.f32 -1.442695, %v1167_v49  ;;  %v1123_v53 = vadd.f32 %v1122_v50, %v1070_v47 }
 0x34f   : > { %v1181_v54 = vadd.f32 1.0, %v1424_v51 }
 0x350   : > { %1427 = vpow2.f32 %v1370_v52  ;;  %v1162_v55 = vadd.f32 %v1158_v44, %v1123_v53 }
 0x351   : > { %1429 = vrcp.f32 %v1181_v54  ;;  %v1210_v1 = vand.u32 2147483648, %v1181_v54  ;;  %v1208_v4 = vand.u32 2147483647, %v1181_v54  ;;  %vm1204_vm5 = vweird.f32 %v1181_v54 }
 0x352   : > { %v1166_v56 = vmax.f32 %v1162_v55, 0.0 }
 0x353   : > { %v1211_v13 = vor.u32 1.1754944e-38, %v1210_v1  ;;  %vm1209_vm7 = vcmp.eq.f32.partialorder %v1208_v4, 8.507059e+37 }
 0x354   : > { %v1426_v57 = vpop.eup %1425  ;;  %v1369_v58 = vmul.f32 -1.442695, %v1166_v56 }
 0x355   : > { %v1180_v59 = vadd.f32 1.0, %v1426_v57 }
 0x356   : > { %v1428_v60 = vpop.eup %1427  ;;  %1431 = vpow2.f32 %v1369_v58 }
 0x357   : > { %v1430_v61 = vpop.eup %1429  ;;  %1433 = vrcp.f32 %v1180_v59  ;;  %v1183_v63 = vadd.f32 1.0, %v1428_v60  ;;  %v1195_v18 = vand.u32 2147483648, %v1180_v59  ;;  %v1193_v21 = vand.u32 2147483647, %v1180_v59 }
 0x358   : > { %v1200_v62 = vmul.f32 %v1430_v61, %v1181_v54  ;;  %vm1205_vm4 = vweird.f32 %v1430_v61  ;;  %vm1189_vm9 = vweird.f32 %v1180_v59 }
 0x359   : > { %1435 = vrcp.f32 %v1183_v63  ;;  %vm1206_vm6 = vmor %vm1204_vm5, %vm1205_vm4  ;;  %v1240_v25 = vand.u32 2147483648, %v1183_v63  ;;  %v1196_v27 = vor.u32 1.1754944e-38, %v1195_v18  ;;  %v1238_v29 = vand.u32 2147483647, %v1183_v63 }
 0x35a   : > { %v1201_v0 = vsub.f32 1.0, %v1200_v62  ;;  %vm1194_vm12 = vcmp.eq.f32.partialorder %v1193_v21, 8.507059e+37  ;;  %vm1234_vm13 = vweird.f32 %v1183_v63 }
 0x35b   : > { %v1241_v33 = vor.u32 1.1754944e-38, %v1240_v25  ;;  %vm1239_vm15 = vcmp.eq.f32.partialorder %v1238_v29, 8.507059e+37 }
 0x35c   : > { %v1432_v2 = vpop.eup %1431  ;;  %v1202_v3 = vmul.f32 %v1430_v61, %v1201_v0 }
 0x35d   : > { %v1434_v5 = vpop.eup %1433  ;;  %v1182_v6 = vadd.f32 1.0, %v1432_v2 }
 0x35e   : > { %v1203_v7 = vadd.f32 %v1430_v61, %v1202_v3  ;;  %v1185_v11 = vmul.f32 %v1434_v5, %v1180_v59  ;;  %vm1190_vm8 = vweird.f32 %v1434_v5 }
 0x35f   : > { %1437 = vrcp.f32 %v1182_v6  ;;  %v1436_v14 = vpop.eup %1435  ;;  %vm1191_vm10 = vmor %vm1189_vm9, %vm1190_vm8  ;;  %v1225_v37 = vand.u32 2147483648, %v1182_v6  ;;  %v1223_v40 = vand.u32 2147483647, %v1182_v6  ;;  %vm1219_vm1 = vweird.f32 %v1182_v6 }
 0x360   : > { %v1207_v15 = vsel %vm1206_vm6, %v1430_v61, %v1203_v7  ;;  %v1186_v16 = vsub.f32 1.0, %v1185_v11  ;;  %v1230_v19 = vmul.f32 %v1436_v14, %v1183_v63  ;;  %vm1235_vm11 = vweird.f32 %v1436_v14 }
 0x361   : > { %v1212_v17 = vsel %vm1209_vm7, %v1211_v13, %v1207_v15  ;;  %vm1236_vm14 = vmor %vm1234_vm13, %vm1235_vm11  ;;  %vm1224_vm3 = vcmp.eq.f32.partialorder %v1223_v40, 8.507059e+37 }
 0x362   : > { %v1187_v20 = vmul.f32 %v1434_v5, %v1186_v16  ;;  %v1245_v22 = vmul.f32 %v1212_v17, %v1681_v12  ;;  %v1231_v23 = vsub.f32 1.0, %v1230_v19 }
 0x364   : > { %v1188_v24 = vadd.f32 %v1434_v5, %v1187_v20  ;;  %1249 = vst [vmem:[%s1985_s18 + $0x8] sm:$0xff] %v1245_v22  ;;  %v1232_v28 = vmul.f32 %v1436_v14, %v1231_v23 }
 0x365   : > { %v1438_v26 = vpop.eup %1437 }
 0x366   : > { %v1192_v30 = vsel %vm1191_vm10, %v1434_v5, %v1188_v24  ;;  %v1215_v31 = vmul.f32 %v1438_v26, %v1182_v6  ;;  %v1233_v32 = vadd.f32 %v1436_v14, %v1232_v28  ;;  %vm1220_vm0 = vweird.f32 %v1438_v26 }
 0x367   : > { %v1197_v12 = vsel %vm1194_vm12, %v1196_v27, %v1192_v30  ;;  %vm1221_vm2 = vmor %vm1219_vm1, %vm1220_vm0 }
 0x368   : > { %v1216_v34 = vsub.f32 1.0, %v1215_v31  ;;  %v1244_v35 = vmul.f32 %v1197_v12, %v1672_v9  ;;  %v1237_v36 = vsel %vm1236_vm14, %v1436_v14, %v1233_v32  ;;  %v1226_v9 = vor.u32 1.1754944e-38, %v1225_v37 }
 0x369   : > { %v1242_v38 = vsel %vm1239_vm15, %v1241_v33, %v1237_v36 }
 0x36a   : > { %v1217_v39 = vmul.f32 %v1438_v26, %v1216_v34  ;;  %1248 = vst [vmem:[%s1985_s18] sm:$0xff] %v1244_v35  ;;  %v1247_v41 = vmul.f32 %v1242_v38, %v1674_v10 }
 0x36c   : > { %v1218_v42 = vadd.f32 %v1438_v26, %v1217_v39  ;;  %1251 = vst [vmem:[%s1985_s18 + $0x18] sm:$0xff] %v1247_v41 }
 0x36e   : > { %v1222_v43 = vsel %vm1221_vm2, %v1438_v26, %v1218_v42 }
 0x36f   : > { %v1227_v44 = vsel %vm1224_vm3, %v1226_v9, %v1222_v43 }
 0x370   : > { %v1246_v45 = vmul.f32 %v1227_v44, %v1670_v8 }
 0x372   : > { %1250 = vst [vmem:[%s1985_s18 + $0x10] sm:$0xff] %v1246_v45 }
 0x373   : > { %1466 = shalt.err (!%p1463_p3)
}
 0x374   : > { %s1504_s30 = smov 256   ;;  %s1505_s18 = smov 16  }
 0x375   : > { %1378 = dma.vmem_to_hbm [thread:$0]  (%p1634_p5), %s1266_s28, 512, %s1268_s27, %s1253_s20, %s1504_s30, %s1504_s30, %s1505_s18  }
 0x376 PF: > { %s2072_s26 = sld [smem:[#allocation7_spill]] }
 0x377   : > { %s2073_s0 = sld [smem:[#allocation5_spill]] }
 0x37c   : > { %p1384_p4 = scmp.ge.s32.totalorder %s2072_s26, 2 }
 0x37d   : > { %s1282_s22 = sand.u32 1, %s2073_s0  }
 0x37e   : > { %p1381_p7 = pnand %p1384_p4, %p1638_p6  ;;  %s1283_s29 = scalar_lea.sflag [#allocation3], %s1282_s22 }
 0x380   : > { %p1382_p8 = pneg %p1381_p7 }
 0x382   : > { %1484 = dma.done.wait (%p1382_p8), %s1283_s29, 512  }
 0x383   : > { %1486 = vsyncadd (%p1382_p8), %s1283_s29, 4294966784  ;;  %s2075_s27 = sld [smem:[#allocation8_spill]]  ;;  %s2078_s24 = smov %s1493_s25 }
 0x384   : > { %s2076_s23 = sld [smem:[#allocation6_spill]] }
 0x385   : > { %s2077_s26 = sld [smem:[#allocation9_spill]] }
 0x389   : > { %p27_p9 = scmp.ge.s32.totalorder %s2075_s27, 4  }
 0x38a   : > { %s2079_s25 = smov %s2076_s23 }
 0x38b   :  { %29 = sbr.rel (!%p27_p9) target bundleno = 8 (0x8), region = 123 }
 0x390   :  { %1289 = vsyncpa [#allocation3], 1 }
 0x391   :  { %1291 = vsyncpa [#allocation3 + $0x1], 1 }

</bundles_post_ra>
